<compile_context>
chip_gen: v7x
topology: tpu7x:2x2x1
jax: 0.10.0
libtpu: 0.0.40
codegen_flags: <defaults>
</compile_context>

<pallas_src>
import functools

import jax
import jax.numpy as jnp
from jax.experimental import pallas as pl
from jax.experimental.pallas import tpu as pltpu

_INV_SQRT2 = 0.7071067811865476


def _round_up(n, m):
    return ((n + m - 1) // m) * m


def _cdiv(a, b):
    return -(-a // b)


def _gelu_exact(h):
    # exact (erf-based) GELU in f32, matching torch.nn.functional.gelu default
    return 0.5 * h * (1.0 + jax.lax.erf(h * jnp.float32(_INV_SQRT2)))


def _vmem_budget_bytes():
    """(usable, physical) per-core VMEM bytes: capacity minus headroom."""
    cap = 64 << 20                           # conservative fallback: v7x per-TC
    try:
        info = pltpu.get_tpu_info()
        cap = int(getattr(info, "vmem_capacity_bytes", cap))
    except Exception:
        pass
    if cap < (32 << 20):
        cap = 64 << 20
    headroom = max(8 << 20, cap // 8)        # ~8 MiB (v7x) .. 16 MiB (v5e/v6e)
    return cap - headroom, cap


def _single_buffered_spec(block_shape, index_map):
    """Single-buffer a block whose index is constant along the inner grid axis
    (saves a full tm x Dp VMEM buffer).  Falls back to a default BlockSpec if
    the pipeline_mode kwarg is unavailable."""
    try:
        return pl.BlockSpec(block_shape, index_map, pipeline_mode=pl.Buffered(1))
    except TypeError:
        return pl.BlockSpec(block_shape, index_map)


# --------------------------------------------------------------------------
# Kernels
# --------------------------------------------------------------------------

def _mlp_kernel_resident(x_ref, w1_ref, b1_ref, w2_ref, b2_ref, o_ref):
    # Weights fully resident in VMEM; 1-D grid over row tiles only.
    # x_ref is already in the weight dtype (cast once in the wrapper).
    h = jnp.dot(x_ref[...], w1_ref[...], preferred_element_type=jnp.float32)
    h = _gelu_exact(h + b1_ref[...])
    y = jnp.dot(h.astype(w2_ref.dtype), w2_ref[...],
                preferred_element_type=jnp.float32) + b2_ref[...]
    # dropout: module evaluated in inference mode -> identity
    # TODO(synk): training-mode dropout would use pltpu.prng_seed +
    #             pltpu.stateful_bernoulli and rescale by 1/(1-p).
    o_ref[...] = y.astype(o_ref.dtype)


def _mlp_kernel_tiled_f32out(x_ref, w1_ref, b1_ref, w2_ref, b2_ref, o_ref):
    # f32 output: accumulate directly into o_ref (no separate acc scratch).
    k = pl.program_id(1)

    @pl.when(k == 0)
    def _():
        o_ref[...] = jnp.zeros_like(o_ref)

    h = jnp.dot(x_ref[...], w1_ref[...], preferred_element_type=jnp.float32)
    h = _gelu_exact(h + b1_ref[...])
    o_ref[...] += jnp.dot(h.astype(w2_ref.dtype), w2_ref[...],
                          preferred_element_type=jnp.float32)

    @pl.when(k == pl.num_programs(1) - 1)
    def _():
        o_ref[...] += b2_ref[...]


def _mlp_kernel_tiled_acc(x_ref, w1_ref, b1_ref, w2_ref, b2_ref, o_ref, acc_ref):
    # Non-f32 output: accumulate in an f32 scratch, cast on the last k step.
    k = pl.program_id(1)

    @pl.when(k == 0)
    def _():
        acc_ref[...] = jnp.zeros_like(acc_ref)

    h = jnp.dot(x_ref[...], w1_ref[...], preferred_element_type=jnp.float32)
    h = _gelu_exact(h + b1_ref[...])
    acc_ref[...] += jnp.dot(h.astype(w2_ref.dtype), w2_ref[...],
                            preferred_element_type=jnp.float32)

    @pl.when(k == pl.num_programs(1) - 1)
    def _():
        o_ref[...] = (acc_ref[...] + b2_ref[...]).astype(o_ref.dtype)


# --------------------------------------------------------------------------
# Wrapper
# --------------------------------------------------------------------------

def prepare_params(w1, b1, w2, b2, dtype=None):
    """One-time weight padding / casting (keep out of the per-call hot path).

    Pads the hidden dim D to a multiple of 128 (lane-dense output) and the
    intermediate dim I to a multiple of 256 (v6e/v7x MXU is 2x256x256).
    Optionally casts to `dtype` (e.g. jnp.bfloat16 for v6e/v7x perf).
    """
    if dtype is not None:
        w1, b1, w2, b2 = (t.astype(dtype) for t in (w1, b1, w2, b2))
    D, I = w1.shape
    Dp = _round_up(D, 128)
    Ip = _round_up(I, 256)
    if Dp != D:
        w1 = jnp.pad(w1, ((0, Dp - D), (0, 0)))
        w2 = jnp.pad(w2, ((0, 0), (0, Dp - D)))
        b2 = jnp.pad(b2, ((0, 0), (0, Dp - D)))
    if Ip != I:
        w1 = jnp.pad(w1, ((0, 0), (0, Ip - I)))
        b1 = jnp.pad(b1, ((0, 0), (0, Ip - I)))
        w2 = jnp.pad(w2, ((0, Ip - I), (0, 0)))
    return w1, b1, w2, b2


@functools.partial(jax.jit, static_argnames=("weights_resident", "tm", "ti"))
def mlp_forward(x, w1, b1, w2, b2, *, weights_resident=None, tm=None, ti=None):
    """Fused MLP forward.

    x:  (B, T, D) activations.
    w1: (Dp, Ip), b1: (1, Ip), w2: (Ip, Dp), b2: (1, Dp) — already padded and
        (optionally) cast by `prepare_params`.
    """
    B, T, D = x.shape
    Dp, Ip = w1.shape
    M = B * T

    wb = jnp.dtype(w1.dtype).itemsize       # weight / compute dtype bytes
    ob = jnp.dtype(x.dtype).itemsize        # output keeps the input dtype
    xb = wb                                 # x is cast to the weight dtype

    # ---- flatten + pad + one-time dtype cast of x (not per grid step) ----
    x2 = x.reshape(M, D)
    if Dp != D:
        x2 = jnp.pad(x2, ((0, 0), (0, Dp - D)))
    if x2.dtype != w1.dtype:
        x2 = x2.astype(w1.dtype)

    # ---- generation-aware VMEM budget ------------------------------------
    budget, cap = _vmem_budget_bytes()

    # conservative (double-buffered) footprint of keeping all weights resident
    weight_bytes = 2 * (2 * Dp * Ip + 8 * Ip + 8 * Dp) * wb

    def _resident_fits(tm_r):
        foot = (weight_bytes
                + 2 * tm_r * Dp * xb        # x tile (double-buffered)
                + 2 * tm_r * Dp * ob        # out tile (double-buffered)
                + tm_r * Ip * 4             # f32 GELU intermediate
                + (4 << 20))                # slack
        return foot <= budget

    if weights_resident is None:
        weights_resident = (weight_bytes <= budget // 3
                            and _resident_fits(min(256, M)))

    # row tile: big on 128-MiB-VMEM parts (v5e/v6e), 512 start on v7x
    tm0 = tm if tm is not None else (1024 if cap >= (100 << 20) else 512)
    tm_ = min(tm0, M)
    if M > 256:
        # guarantee >= 2 row tiles so both v7x TensorCores get work
        tm_ = min(tm_, max(256, _round_up(_cdiv(M, 2), 8)))

    out_is_f32 = x.dtype == jnp.float32
    flops = 4 * M * Dp * Ip

    if weights_resident:
        while tm_ > 256 and not _resident_fits(tm_):
            tm_ = max(256, _round_up(tm_ // 2, 8))
        grid0 = _cdiv(M, tm_)
        footprint = weight_bytes + 2 * tm_ * Dp * (xb + ob) + tm_ * Ip * 4
        cost = pl.CostEstimate(
            flops=flops, transcendentals=M * Ip,
            bytes_accessed=(M * Dp * (xb + ob) + (2 * Dp * Ip + Ip + Dp) * wb))
        out2 = pl.pallas_call(
            _mlp_kernel_resident,
            out_shape=jax.ShapeDtypeStruct((M, Dp), x.dtype),
            grid_spec=pltpu.PrefetchScalarGridSpec(
                num_scalar_prefetch=0,
                grid=(grid0,),
                in_specs=[
                    pl.BlockSpec((tm_, Dp), lambda i: (i, 0)),   # x rows
                    pl.BlockSpec((Dp, Ip), lambda i: (0, 0)),    # w1 (resident)
                    pl.BlockSpec((1, Ip), lambda i: (0, 0)),     # b1 (resident)
                    pl.BlockSpec((Ip, Dp), lambda i: (0, 0)),    # w2 (resident)
                    pl.BlockSpec((1, Dp), lambda i: (0, 0)),     # b2 (resident)
                ],
                out_specs=pl.BlockSpec((tm_, Dp), lambda i: (i, 0)),
            ),
            compiler_params=pltpu.CompilerParams(
                dimension_semantics=("parallel",),
                vmem_limit_bytes=int(min(max(footprint + (8 << 20), 32 << 20),
                                         budget))),
            cost_estimate=cost,
        )(x2, w1, b1, w2, b2)
    else:
        # intermediate-dim tile: multiple of 256 that divides Ip
        if ti is None or Ip % ti != 0:
            ti = 512 if Ip % 512 == 0 else 256
        ti = min(ti, Ip)

        def _tiled_footprint(tm_t, ti_t):
            return (1 * tm_t * Dp * xb         # x tile (single-buffered, const in k)
                    + 2 * tm_t * Dp * ob       # out tile (revisited accumulator)
                    + 2 * Dp * ti_t * wb       # w1 tile (double-buffered)
                    + 2 * ti_t * Dp * wb       # w2 tile (double-buffered)
                    + 2 * 8 * ti_t * wb        # b1 tile (sublane padded)
                    + 2 * 8 * Dp * wb          # b2 tile
                    + tm_t * ti_t * 4          # f32 GELU intermediate
                    + (0 if out_is_f32 else tm_t * Dp * 4)   # acc scratch
                    + (4 << 20))               # slack

        while tm_ > 256 and _tiled_footprint(tm_, ti) > budget:
            tm_ = max(256, _round_up(tm_ // 2, 8))
        while ti > 256 and _tiled_footprint(tm_, ti) > budget:
            ti = max(256, ti // 2)

        grid0 = _cdiv(M, tm_)
        footprint = _tiled_footprint(tm_, ti)
        cost = pl.CostEstimate(
            flops=flops, transcendentals=M * Ip,
            # weights are re-streamed from HBM once per row tile
            bytes_accessed=(M * Dp * (xb + ob)
                            + grid0 * (2 * Dp * Ip + Ip + Dp) * wb))
        kernel = _mlp_kernel_tiled_f32out if out_is_f32 else _mlp_kernel_tiled_acc
        scratch = () if out_is_f32 else (pltpu.VMEM((tm_, Dp), jnp.float32),)
        out2 = pl.pallas_call(
            kernel,
            out_shape=jax.ShapeDtypeStruct((M, Dp), x.dtype),
            grid_spec=pltpu.PrefetchScalarGridSpec(
                num_scalar_prefetch=0,
                grid=(grid0, Ip // ti),
                in_specs=[
                    _single_buffered_spec((tm_, Dp), lambda i, k: (i, 0)),  # x
                    pl.BlockSpec((Dp, ti), lambda i, k: (0, k)),            # w1
                    pl.BlockSpec((1, ti), lambda i, k: (0, k)),             # b1
                    pl.BlockSpec((ti, Dp), lambda i, k: (k, 0)),            # w2
                    pl.BlockSpec((1, Dp), lambda i, k: (0, 0)),             # b2
                ],
                out_specs=pl.BlockSpec((tm_, Dp), lambda i, k: (i, 0)),
                scratch_shapes=scratch,
            ),
            compiler_params=pltpu.CompilerParams(
                dimension_semantics=("parallel", "arbitrary"),
                vmem_limit_bytes=int(min(max(footprint + (8 << 20), 32 << 20),
                                         budget))),
            cost_estimate=cost,
        )(x2, w1, b1, w2, b2)

    if Dp != D:
        out2 = out2[:, :D]
    return out2.reshape(B, T, D)


def init_params(key, hidden_dim, intermediate_dim, dtype=jnp.float32):
    """Deterministic init mimicking torch.nn.Linear (uniform +-1/sqrt(fan_in)).

    Weights are stored as (in, out) for direct x @ w use.  For v6e/v7x perf,
    pass dtype=jnp.bfloat16; the kernel keeps f32 accumulation and f32 GELU.
    """
    k1, k2, k3, k4 = jax.random.split(key, 4)
    bound1 = 1.0 / (hidden_dim ** 0.5)
    bound2 = 1.0 / (intermediate_dim ** 0.5)
    w1 = jax.random.uniform(k1, (hidden_dim, intermediate_dim),
                            jnp.float32, -bound1, bound1).astype(dtype)
    b1 = jax.random.uniform(k2, (1, intermediate_dim),
                            jnp.float32, -bound1, bound1).astype(dtype)
    w2 = jax.random.uniform(k3, (intermediate_dim, hidden_dim),
                            jnp.float32, -bound2, bound2).astype(dtype)
    b2 = jax.random.uniform(k4, (1, hidden_dim),
                            jnp.float32, -bound2, bound2).astype(dtype)
    return w1, b1, w2, b2


if __name__ == "__main__":
    hidden_dim = 32
    intermediate_dim = hidden_dim * 4      # module default
    B, T = 2, 8

    key = jax.random.PRNGKey(0)
    kx, kp = jax.random.split(key)
    x = jax.random.normal(kx, (B, T, hidden_dim), dtype=jnp.float32)
    w1, b1, w2, b2 = init_params(kp, hidden_dim, intermediate_dim)
    pw1, pb1, pw2, pb2 = prepare_params(w1, b1, w2, b2)

    # plain-JAX reference (f32, unpadded weights)
    h_ref = x.reshape(-1, hidden_dim) @ w1 + b1
    h_ref = 0.5 * h_ref * (1.0 + jax.lax.erf(h_ref * _INV_SQRT2))
    y_ref = (h_ref @ w2 + b2).reshape(B, T, hidden_dim)

    # --- resident-weights fast path (auto-selected at these shapes) --------
    out = mlp_forward(x, pw1, pb1, pw2, pb2)
    jax.block_until_ready(out)
    assert jnp.allclose(out, y_ref, atol=1e-4, rtol=1e-4), "resident path mismatch"

    # --- force the k-tiled (intermediate-dim reduction) path as well -------
    out_tiled = mlp_forward(x, pw1, pb1, pw2, pb2, weights_resident=False, ti=128)
    jax.block_until_ready(out_tiled)
    assert jnp.allclose(out_tiled, y_ref, atol=1e-4, rtol=1e-4), "tiled path mismatch"

    print("KERNEL_OK")
</pallas_src>

<mosaic_0001>
module attributes {stable_mosaic.version = 11 : i64} {
  func.func @_mlp_kernel_resident(%arg0: i32, %arg1: memref<16x128xf32, #tpu.memory_space<vmem>>, %arg2: memref<128x256xf32, #tpu.memory_space<vmem>>, %arg3: memref<1x256xf32, #tpu.memory_space<vmem>>, %arg4: memref<256x128xf32, #tpu.memory_space<vmem>>, %arg5: memref<1x128xf32, #tpu.memory_space<vmem>>, %arg6: memref<16x128xf32, #tpu.memory_space<vmem>>) attributes {dimension_semantics = [#tpu.dimension_semantics<parallel>], iteration_bounds = array<i64: 1>, scalar_prefetch = 0 : i64, scratch_operands = 0 : i64, tpu.core_type = #tpu.core_type<tc>, window_params = [{transform_indices = @transform_0, window_bounds = array<i64: 16, 128>}, {pipeline_mode = #tpu.pipeline_mode<synchronous>, transform_indices = @transform_1, window_bounds = array<i64: 128, 256>}, {pipeline_mode = #tpu.pipeline_mode<synchronous>, transform_indices = @transform_2, window_bounds = array<i64: 1, 256>}, {pipeline_mode = #tpu.pipeline_mode<synchronous>, transform_indices = @transform_3, window_bounds = array<i64: 256, 128>}, {pipeline_mode = #tpu.pipeline_mode<synchronous>, transform_indices = @transform_4, window_bounds = array<i64: 1, 128>}, {transform_indices = @transform_5, window_bounds = array<i64: 16, 128>}]} {
    %c0 = arith.constant 0 : index
    %c0_0 = arith.constant 0 : index
    %0 = vector.load %arg1[%c0, %c0_0] : memref<16x128xf32, #tpu.memory_space<vmem>>, vector<16x128xf32>
    %c0_1 = arith.constant 0 : index
    %c0_2 = arith.constant 0 : index
    %1 = vector.load %arg2[%c0_1, %c0_2] : memref<128x256xf32, #tpu.memory_space<vmem>>, vector<128x256xf32>
    %cst = arith.constant dense<0.000000e+00> : vector<16x256xf32>
    %2 = tpu.matmul %0, %1, %cst {dimension_numbers = #tpu.dot_dimension_numbers<[1], [0], [0], [1], [0, 0, 1, 1], [], []>} : vector<16x128xf32>, vector<128x256xf32>, vector<16x256xf32> -> vector<16x256xf32>
    %c0_3 = arith.constant 0 : index
    %c0_4 = arith.constant 0 : index
    %3 = vector.load %arg3[%c0_3, %c0_4] : memref<1x256xf32, #tpu.memory_space<vmem>>, vector<1x256xf32>
    %4 = vector.broadcast %3 : vector<1x256xf32> to vector<16x256xf32>
    %5 = arith.addf %2, %4 : vector<16x256xf32>
    %cst_5 = arith.constant 5.000000e-01 : f32
    %6 = vector.broadcast %cst_5 : f32 to vector<16x256xf32>
    %7 = arith.mulf %6, %5 : vector<16x256xf32>
    %cst_6 = arith.constant 0.707106769 : f32
    %8 = vector.broadcast %cst_6 : f32 to vector<16x256xf32>
    %9 = arith.mulf %5, %8 : vector<16x256xf32>
    %10 = math.erf %9 : vector<16x256xf32>
    %cst_7 = arith.constant 1.000000e+00 : f32
    %11 = vector.broadcast %cst_7 : f32 to vector<16x256xf32>
    %12 = arith.addf %11, %10 : vector<16x256xf32>
    %13 = arith.mulf %7, %12 : vector<16x256xf32>
    %c0_8 = arith.constant 0 : index
    %c0_9 = arith.constant 0 : index
    %14 = vector.load %arg4[%c0_8, %c0_9] : memref<256x128xf32, #tpu.memory_space<vmem>>, vector<256x128xf32>
    %cst_10 = arith.constant dense<0.000000e+00> : vector<16x128xf32>
    %15 = tpu.matmul %13, %14, %cst_10 {dimension_numbers = #tpu.dot_dimension_numbers<[1], [0], [0], [1], [0, 0, 1, 1], [], []>} : vector<16x256xf32>, vector<256x128xf32>, vector<16x128xf32> -> vector<16x128xf32>
    %c0_11 = arith.constant 0 : index
    %c0_12 = arith.constant 0 : index
    %16 = vector.load %arg5[%c0_11, %c0_12] : memref<1x128xf32, #tpu.memory_space<vmem>>, vector<1x128xf32>
    %17 = vector.broadcast %16 : vector<1x128xf32> to vector<16x128xf32>
    %18 = arith.addf %15, %17 : vector<16x128xf32>
    %c0_13 = arith.constant 0 : index
    %c0_14 = arith.constant 0 : index
    %19 = vector.load %arg6[%c0_13, %c0_14] : memref<16x128xf32, #tpu.memory_space<vmem>>, vector<16x128xf32>
    tpu.vector_store %arg6[%c0_13, %c0_14], %18 {strides = array<i32>} : memref<16x128xf32, #tpu.memory_space<vmem>>, vector<16x128xf32>,
    return
  }
  func.func @transform_0(%arg0: i32) -> (i32, i32) {
    %c0_i32 = arith.constant 0 : i32
    %c0_i32_0 = arith.constant 0 : i32
    return %arg0, %c0_i32 : i32, i32
  }
  func.func @transform_1(%arg0: i32) -> (i32, i32) {
    %c0_i32 = arith.constant 0 : i32
    %c0_i32_0 = arith.constant 0 : i32
    %c0_i32_1 = arith.constant 0 : i32
    return %c0_i32, %c0_i32_0 : i32, i32
  }
  func.func @transform_2(%arg0: i32) -> (i32, i32) {
    %c0_i32 = arith.constant 0 : i32
    %c0_i32_0 = arith.constant 0 : i32
    %c0_i32_1 = arith.constant 0 : i32
    return %c0_i32, %c0_i32_0 : i32, i32
  }
  func.func @transform_3(%arg0: i32) -> (i32, i32) {
    %c0_i32 = arith.constant 0 : i32
    %c0_i32_0 = arith.constant 0 : i32
    %c0_i32_1 = arith.constant 0 : i32
    return %c0_i32, %c0_i32_0 : i32, i32
  }
  func.func @transform_4(%arg0: i32) -> (i32, i32) {
    %c0_i32 = arith.constant 0 : i32
    %c0_i32_0 = arith.constant 0 : i32
    %c0_i32_1 = arith.constant 0 : i32
    return %c0_i32, %c0_i32_0 : i32, i32
  }
  func.func @transform_5(%arg0: i32) -> (i32, i32) {
    %c0_i32 = arith.constant 0 : i32
    %c0_i32_0 = arith.constant 0 : i32
    return %arg0, %c0_i32 : i32, i32
  }
}

</mosaic_0001>

<bundles_post_ra>
// kernel: mlp_forward.1
= control target key start
LH: loop header
LB: loop body
LE: loop exit
PB: predicated region body
PF: predicated region fallthrough
CT: control target
= control target key end

     0   :  { %10 = vsyncpa [#allocation3], 0  ;;  %s560_s0 = inlined_call_operand.vmem [shape: f32[16,128], index: 0, kind: input, shape index: {}]   ;;  %s561_s1 = inlined_call_operand.hbm [shape: f32[128,256], index: 1, kind: input, shape index: {}]   ;;  %s562_s2 = inlined_call_operand.vmem [shape: f32[1,256], index: 2, kind: input, shape index: {}]   ;;  %s563_s3 = inlined_call_operand.hbm [shape: f32[256,128], index: 3, kind: input, shape index: {}]   ;;  %s564_s4 = inlined_call_operand.vmem [shape: f32[1,128], index: 4, kind: input, shape index: {}]   ;;  %s565_s5 = inlined_call_operand.vmem [shape: f32[16,128], index: 5, kind: output, shape index: {}]  }
   0x1   :  { %11 = vsyncpa [#allocation5], 0  ;;  %s479_s18 = smov [#allocation2]   ;;  %s431_s22 = scalar_lea.hbm %s561_s1, 4096 }
   0x2   :  { %s19_s19 = sshll.u32 %s479_s18, 4  ;;  %p432_p0 = scmp.ne.s32.totalorder %s561_s1, %s431_s22  ;;  %s20_s19 = int_to_ptr.vmem [resolvable:$true] %s19_s19 }
   0x3   :  { %p435_p1 = scmp.lt.u32.totalorder %s431_s22, %s561_s1 }
   0x5   :  { %p437_p2 = pnand %p435_p1, %p432_p0 }
   0x7   :  { %440 = shalt.err (!%p437_p2)
}
   0x8   :  { %s441_s27 = scalar_lea.vmem %s20_s19, 4096  ;;  %p446_p4 = scmp.lt.s32.totalorder %s20_s19, %s20_s19 }
   0x9   :  { %p442_p3 = scmp.ne.s32.totalorder %s20_s19, %s441_s27  ;;  %p447_p5 = scmp.lt.s32.totalorder %s441_s27, %s441_s27 }
   0xb   :  { %p448_p6 = por %p447_p5, %p446_p4 }
   0xd   :  { %p449_p7 = pnand %p448_p6, %p442_p3 }
   0xf   :  { %452 = shalt.err (!%p449_p7)
}
  0x10   :  { %s480_s28 = smov 256   ;;  %s481_s29 = smov 16  }
  0x11   :  { %25 = dma.hbm_to_vmem [thread:$0]  %s561_s1, 4096, %s20_s19, [#allocation3], %s480_s28, %s480_s28, %s481_s29  }
  0x12   :  { %s482_s7 = smov [#allocation4]   ;;  %s453_s11 = scalar_lea.hbm %s563_s3, 4096 }
  0x13   :  { %s33_s8 = sshll.u32 %s482_s7, 4  ;;  %p454_p8 = scmp.ne.s32.totalorder %s563_s3, %s453_s11  ;;  %s34_s8 = int_to_ptr.vmem [resolvable:$true] %s33_s8 }
  0x14   :  { %p457_p9 = scmp.lt.u32.totalorder %s453_s11, %s563_s3 }
  0x16   :  { %p459_p10 = pnand %p457_p9, %p454_p8 }
  0x18   :  { %462 = shalt.err (!%p459_p10)
}
  0x19   :  { %s463_s16 = scalar_lea.vmem %s34_s8, 4096  ;;  %p468_p12 = scmp.lt.s32.totalorder %s34_s8, %s34_s8 }
  0x1a   :  { %p464_p11 = scmp.ne.s32.totalorder %s34_s8, %s463_s16  ;;  %p469_p13 = scmp.lt.s32.totalorder %s463_s16, %s463_s16 }
  0x1c   :  { %p470_p0 = por %p469_p13, %p468_p12 }
  0x1e   :  { %p471_p1 = pnand %p470_p0, %p464_p11 }
  0x20   :  { %474 = shalt.err (!%p471_p1)
}
  0x21   :  { %s483_s1 = smov 128   ;;  %s484_s17 = smov 8  }
  0x22   :  { %39 = dma.hbm_to_vmem [thread:$0]  %s563_s3, 4096, %s34_s8, [#allocation5], %s483_s1, %s483_s1, %s484_s17  }
  0x23   :  { %475 = dma.done.wait [#allocation3], 4096  }
  0x24   :  { %476 = vsyncadd [#allocation3], 4294963200 }
  0x25   :  { %477 = dma.done.wait [#allocation5], 4096  }
  0x26   :  { %478 = vsyncadd [#allocation5], 4294963200  ;;  %v485_v0 = vmov 0.0   ;;  %v51_v1 = vld [vmem:[#allocation2 + $0x8] sm:$0xff]  ;;  %v53_v2 = vld [vmem:[#allocation2 + $0x18] sm:$0xff] }
  0x27   :  { %158 = vmatprep.mubr.f32.mxu0 %v485_v0  ;;  %v50_v3 = vld [vmem:[#allocation2] sm:$0xff]  ;;  %v352_v4 = vpack.c.bf16 %v53_v2, %v51_v1  ;;  %v52_v5 = vld [vmem:[#allocation2 + $0x10] sm:$0xff]  ;;  %v55_v6 = vld [vmem:[#allocation2 + $0x28] sm:$0xff] }
  0x28   :  { %v57_v7 = vld [vmem:[#allocation2 + $0x38] sm:$0xff]  ;;  %v354_v8 = vpack.c.bf16 %v52_v5, %v50_v3  ;;  %v54_v10 = vld [vmem:[#allocation2 + $0x20] sm:$0xff]  ;;  %v56_v11 = vld [vmem:[#allocation2 + $0x30] sm:$0xff] }
  0x29   :  { %v356_v9 = vpack.c.bf16 %v57_v7, %v55_v6  ;;  %v59_v12 = vld [vmem:[#allocation2 + $0x48] sm:$0xff]  ;;  %353 = vmatprep.subr.bf16.mxu0 %v352_v4  ;;  %v61_v13 = vld [vmem:[#allocation2 + $0x58] sm:$0xff]  ;;  %v358_v14 = vpack.c.bf16 %v56_v11, %v54_v10  ;;  %v58_v16 = vld [vmem:[#allocation2 + $0x40] sm:$0xff] }
  0x2a   :  { %355 = vmatpush1.bf16.msra.mxu0 %v354_v8  ;;  %v360_v15 = vpack.c.bf16 %v61_v13, %v59_v12  ;;  %v60_v17 = vld [vmem:[#allocation2 + $0x50] sm:$0xff]  ;;  %v63_v18 = vld [vmem:[#allocation2 + $0x68] sm:$0xff]  ;;  %v65_v19 = vld [vmem:[#allocation2 + $0x78] sm:$0xff] }
  0x2b   :  { %357 = vmatprep.subr.bf16.mxu0 %v356_v9  ;;  %v362_v20 = vpack.c.bf16 %v60_v17, %v58_v16  ;;  %v364_v21 = vpack.c.bf16 %v65_v19, %v63_v18  ;;  %v62_v22 = vld [vmem:[#allocation2 + $0x60] sm:$0xff]  ;;  %v64_v23 = vld [vmem:[#allocation2 + $0x70] sm:$0xff]  ;;  %v67_v24 = vld [vmem:[#allocation2 + $0x88] sm:$0xff] }
  0x2c   :  { %v69_v25 = vld [vmem:[#allocation2 + $0x98] sm:$0xff]  ;;  %v66_v26 = vld [vmem:[#allocation2 + $0x80] sm:$0xff]  ;;  %v68_v27 = vld [vmem:[#allocation2 + $0x90] sm:$0xff]  ;;  %v366_v30 = vpack.c.bf16 %v64_v23, %v62_v22 }
  0x2d   :  { %v207_v28 = vld [vmem:[#allocation4 + $0x80] sm:$0xff]  ;;  %v208_v29 = vld [vmem:[#allocation4 + $0x88] sm:$0xff]  ;;  %v209_v35 = vld [vmem:[#allocation4 + $0x90] sm:$0xff]  ;;  %v368_v36 = vpack.c.bf16 %v69_v25, %v67_v24  ;;  %v370_v46 = vpack.c.bf16 %v68_v27, %v66_v26 }
  0x2e   :  { %359 = vmatpush1.bf16.msra.mxu0 %v358_v14  ;;  %v71_v31 = vld [vmem:[#allocation2 + $0xa8] sm:$0xff]  ;;  %v384_v32 = vpack.c.bf16 %v208_v29, %v207_v28  ;;  %v191_v33 = vld [vmem:[#allocation4] sm:$0xff]  ;;  %v210_v38 = vld [vmem:[#allocation4 + $0x98] sm:$0xff] }
  0x2f   :  { %361 = vmatprep.subr.bf16.mxu0 %v360_v15  ;;  %v192_v34 = vld [vmem:[#allocation4 + $0x8] sm:$0xff]  ;;  %v193_v39 = vld [vmem:[#allocation4 + $0x10] sm:$0xff]  ;;  %v194_v40 = vld [vmem:[#allocation4 + $0x18] sm:$0xff]  ;;  %v388_v42 = vpack.c.bf16 %v210_v38, %v209_v35  ;;  %v84_v35 = vlaneseq }
  0x30   :  { %v386_v37 = vpack.c.bf16 %v192_v34, %v191_v33  ;;  %v73_v41 = vld [vmem:[#allocation2 + $0xb8] sm:$0xff]  ;;  %385 = vmatprep.subr.bf16.mxu1 %v384_v32  ;;  %v211_v43 = vld [vmem:[#allocation4 + $0xa0] sm:$0xff]  ;;  %v212_v44 = vld [vmem:[#allocation4 + $0xa8] sm:$0xff]  ;;  %v390_v45 = vpack.c.bf16 %v194_v40, %v193_v39 }
  0x31   :  { %v392_v47 = vpack.c.bf16 %v212_v44, %v211_v43  ;;  %v195_v48 = vld [vmem:[#allocation4 + $0x20] sm:$0xff]  ;;  %v196_v49 = vld [vmem:[#allocation4 + $0x28] sm:$0xff]  ;;  %v372_v50 = vpack.c.bf16 %v73_v41, %v71_v31  ;;  %v72_v52 = vld [vmem:[#allocation2 + $0xb0] sm:$0xff] }
  0x32   :  { %363 = vmatpush1.bf16.msra.mxu0 %v362_v20  ;;  %387 = vmatpush3.bf16.msra.mxu1 %v386_v37  ;;  %v70_v51 = vld [vmem:[#allocation2 + $0xa0] sm:$0xff]  ;;  %v75_v53 = vld [vmem:[#allocation2 + $0xc8] sm:$0xff]  ;;  %v77_v54 = vld [vmem:[#allocation2 + $0xd8] sm:$0xff]  ;;  %v394_v55 = vpack.c.bf16 %v196_v49, %v195_v48 }
  0x33   :  { %365 = vmatprep.subr.bf16.mxu0 %v364_v21  ;;  %389 = vmatprep.subr.bf16.mxu1 %v388_v42  ;;  %v374_v56 = vpack.c.bf16 %v72_v52, %v70_v51  ;;  %v376_v57 = vpack.c.bf16 %v77_v54, %v75_v53  ;;  %v74_v58 = vld [vmem:[#allocation2 + $0xc0] sm:$0xff]  ;;  %v76_v59 = vld [vmem:[#allocation2 + $0xd0] sm:$0xff]  ;;  %v79_v60 = vld [vmem:[#allocation2 + $0xe8] sm:$0xff] }
  0x34   :  { %v81_v61 = vld [vmem:[#allocation2 + $0xf8] sm:$0xff]  ;;  %v378_v62 = vpack.c.bf16 %v76_v59, %v74_v58  ;;  %v78_v1 = vld [vmem:[#allocation2 + $0xe0] sm:$0xff]  ;;  %v80_v2 = vld [vmem:[#allocation2 + $0xf0] sm:$0xff] }
  0x35   :  { %v380_v63 = vpack.c.bf16 %v81_v61, %v79_v60  ;;  %v382_v3 = vpack.c.bf16 %v80_v2, %v78_v1  ;;  %v48_v4 = vld [vmem:[%s560_s0] sm:$0xff]  ;;  %v49_v5 = vld [vmem:[%s560_s0 + $0x8] sm:$0xff]  ;;  %v213_v6 = vld [vmem:[#allocation4 + $0xb0] sm:$0xff] }
  0x36   :  { %367 = vmatpush1.bf16.msra.mxu0 %v366_v30  ;;  %391 = vmatpush3.bf16.msra.mxu1 %v390_v45  ;;  %v214_v7 = vld [vmem:[#allocation4 + $0xb8] sm:$0xff]  ;;  %v197_v9 = vld [vmem:[#allocation4 + $0x30] sm:$0xff]  ;;  %v215_v12 = vld [vmem:[#allocation4 + $0xc0] sm:$0xff] }
  0x37   :  { %369 = vmatprep.subr.bf16.mxu0 %v368_v36  ;;  %393 = vmatprep.subr.bf16.mxu1 %v392_v47  ;;  %v396_v8 = vpack.c.bf16 %v214_v7, %v213_v6  ;;  %v198_v10 = vld [vmem:[#allocation4 + $0x38] sm:$0xff]  ;;  %v216_v13 = vld [vmem:[#allocation4 + $0xc8] sm:$0xff]  ;;  %v199_v15 = vld [vmem:[#allocation4 + $0x40] sm:$0xff]  ;;  %v85_v36 = vshrl.u32 %v84_v35, 7 }
  0x38   :  { %v398_v11 = vpack.c.bf16 %v198_v10, %v197_v9  ;;  %v400_v14 = vpack.c.bf16 %v216_v13, %v215_v12  ;;  %v200_v16 = vld [vmem:[#allocation4 + $0x48] sm:$0xff]  ;;  %v218_v18 = vld [vmem:[#allocation4 + $0xd8] sm:$0xff]  ;;  %v201_v20 = vld [vmem:[#allocation4 + $0x50] sm:$0xff] }
  0x39   :  { %v402_v17 = vpack.c.bf16 %v200_v16, %v199_v15  ;;  %v202_v21 = vld [vmem:[#allocation4 + $0x58] sm:$0xff]  ;;  %v219_v23 = vld [vmem:[#allocation4 + $0xe0] sm:$0xff]  ;;  %v220_v24 = vld [vmem:[#allocation4 + $0xe8] sm:$0xff]  ;;  %v86_v37 = vsub.s32 0, %v85_v36  ;;  %v90_v39 = vsub.s32 1, %v85_v36 }
  0x3a   :  { %371 = vmatpush1.bf16.msra.mxu0 %v370_v46  ;;  %395 = vmatpush3.bf16.msra.mxu1 %v394_v55  ;;  %v406_v22 = vpack.c.bf16 %v202_v21, %v201_v20  ;;  %v408_v25 = vpack.c.bf16 %v220_v24, %v219_v23  ;;  %v203_v26 = vld [vmem:[#allocation4 + $0x60] sm:$0xff]  ;;  %v204_v27 = vld [vmem:[#allocation4 + $0x68] sm:$0xff]  ;;  %v221_v29 = vld [vmem:[#allocation4 + $0xf0] sm:$0xff] }
  0x3b   :  { %373 = vmatprep.subr.bf16.mxu0 %v372_v50  ;;  %397 = vmatprep.subr.bf16.mxu1 %v396_v8  ;;  %v410_v28 = vpack.c.bf16 %v204_v27, %v203_v26  ;;  %v222_v30 = vld [vmem:[#allocation4 + $0xf8] sm:$0xff]  ;;  %v205_v32 = vld [vmem:[#allocation4 + $0x70] sm:$0xff]  ;;  %v82_v38 = vld [vmem:[%s562_s2] sm:$0x3] }
  0x3c   :  { %v412_v31 = vpack.c.bf16 %v222_v30, %v221_v29  ;;  %v206_v33 = vld [vmem:[#allocation4 + $0x78] sm:$0xff]  ;;  %v87_v40 = vrot.slane %v82_v38, %v86_v37  ;;  %v91_v41 = vrot.slane %v82_v38, %v90_v39  ;;  %v313_v8 = vld [vmem:[%s564_s4] ss:$0 sm:$0xff] }
  0x3d   :  { %v414_v34 = vpack.c.bf16 %v206_v33, %v205_v32 }
  0x3e   :  { %375 = vmatpush1.bf16.msra.mxu0 %v374_v56  ;;  %399 = vmatpush3.bf16.msra.mxu1 %v398_v11 }
  0x3f   :  { %377 = vmatprep.subr.bf16.mxu0 %v376_v57  ;;  %401 = vmatprep.subr.bf16.mxu1 %v400_v14 }
  0x42   :  { %379 = vmatpush1.bf16.msra.mxu0 %v378_v62  ;;  %403 = vmatpush3.bf16.msra.mxu1 %v402_v17 }
  0x43   :  { %381 = vmatprep.subr.bf16.mxu0 %v380_v63 }
  0x46   :  { %383 = vmatpush1.bf16.msra.mxu0 %v382_v3 }
  0x49   :  { %159 = vmatmul.mubr.f32.vlgmr.msra.gmra.mrb[0].mxu0 %v48_v4 }
  0x4a   :  { %164 = vmatprep.mubr.f32.mxu0 %v485_v0  ;;  %v217_v0 = vld [vmem:[#allocation4 + $0xd0] sm:$0xff] }
  0x4b   :  { %v404_v19 = vpack.c.bf16 %v218_v18, %v217_v0 }
  0x4d   :  { %165 = vmatmul.mubr.f32.gmra.mrb[2].mxu0 %v49_v5  ;;  %405 = vmatprep.subr.bf16.mxu1 %v404_v19 }
  0x4e   :  { %407 = vmatpush3.bf16.msra.mxu1 %v406_v22 }
  0x4f   :  { %409 = vmatprep.subr.bf16.mxu1 %v408_v25 }
  0x52   :  { %411 = vmatpush3.bf16.msra.mxu1 %v410_v28 }
  0x53   :  { %413 = vmatprep.subr.bf16.mxu1 %v412_v31 }
  0x56   :  { %415 = vmatpush3.bf16.msra.mxu1 %v414_v34 }
 0x11c   :  { %v160_v42 = vpop.f32.mrb[0].mxu0 }
 0x11d   :  { %v161_v43 = vadd.f32 %v160_v42, %v87_v40  ;;  %v162_v44 = vpop.f32.mrb[1].mxu0 }
 0x11e   :  { %v163_v45 = vadd.f32 %v162_v44, %v91_v41 }
 0x11f   :  { %v175_v46 = vmul.f32 0.70710677, %v161_v43  ;;  %v171_v59 = vmul.f32 0.5, %v161_v43 }
 0x120   :  { %v176_v47 = vmul.f32 0.70710677, %v163_v45  ;;  %v166_v48 = vpop.f32.mrb[2].mxu0  ;;  %v172_v57 = vmul.f32 0.5, %v163_v45 }
 0x121   :  { %423 = verf.f32 %v175_v46  ;;  %v167_v49 = vadd.f32 %v166_v48, %v87_v40  ;;  %v168_v50 = vpop.f32.mrb[3].mxu0 }
 0x122   :  { %425 = verf.f32 %v176_v47  ;;  %v169_v51 = vadd.f32 %v168_v50, %v91_v41 }
 0x123   :  { %v177_v52 = vmul.f32 0.70710677, %v167_v49  ;;  %v173_v4 = vmul.f32 0.5, %v167_v49 }
 0x124   :  { %v178_v53 = vmul.f32 0.70710677, %v169_v51  ;;  %v174_v2 = vmul.f32 0.5, %v169_v51 }
 0x125   :  { %427 = verf.f32 %v177_v52 }
 0x126   :  { %429 = verf.f32 %v178_v53 }
 0x12b   :  { %v424_v54 = vpop.eup %423 }
 0x12c   :  { %v426_v55 = vpop.eup %425  ;;  %v183_v56 = vadd.f32 1.0, %v424_v54 }
 0x12d   :  { %v184_v58 = vadd.f32 1.0, %v426_v55 }
 0x12e   :  { %v187_v1 = vmul.f32 %v183_v56, %v171_v59 }
 0x12f   :  { %v428_v60 = vpop.eup %427  ;;  %v188_v61 = vmul.f32 %v184_v58, %v172_v57 }
 0x130   :  { %v430_v62 = vpop.eup %429  ;;  %v185_v63 = vadd.f32 1.0, %v428_v60 }
 0x131   :  { %v186_v3 = vadd.f32 1.0, %v430_v62  ;;  %294 = vmatprep.mubr.f32.mxu1 %v188_v61 }
 0x132   :  { %295 = vmatmul.mubr.f32.vlgmr.msra.gmra.mrb[0].mxu1 %v187_v1  ;;  %v189_v6 = vmul.f32 %v185_v63, %v173_v4 }
 0x133   :  { %v190_v5 = vmul.f32 %v186_v3, %v174_v2 }
 0x135   :  { %299 = vmatprep.mubr.f32.mxu1 %v190_v5 }
 0x136   :  { %300 = vmatmul.mubr.f32.gmra.mrb[2].mxu1 %v189_v6 }
 0x205   :  { %v346_v7 = vpop.f32.mrb[0].mxu1 }
 0x206   :  { %v347_v9 = vpop.f32.mrb[1].mxu1 }
 0x207   :  { %v348_v10 = vadd.f32 %v347_v9, %v346_v7 }
 0x209   :  { %v297_v11 = vadd.f32 %v348_v10, %v313_v8  ;;  %v349_v12 = vpop.f32.mrb[2].mxu1 }
 0x20a   :  { %v350_v13 = vpop.f32.mrb[3].mxu1 }
 0x20b   :  { %305 = vst [vmem:[%s565_s5] sm:$0xff] %v297_v11  ;;  %v351_v14 = vadd.f32 %v350_v13, %v349_v12 }
 0x20d   :  { %v302_v15 = vadd.f32 %v351_v14, %v313_v8 }
 0x20f   :  { %306 = vst [vmem:[%s565_s5 + $0x8] sm:$0xff] %v302_v15 }
 0x210   :  { %311 = vsyncpa [#allocation3], 1 }
 0x211   :  { %312 = vsyncpa [#allocation5], 1 }

</bundles_post_ra>
